<compile_context>
chip_gen: v7x
topology: tpu7x:2x2x1
jax: 0.10.0
libtpu: 0.0.40
codegen_flags: <defaults>
</compile_context>

<pallas_src>
import functools

import jax
import jax.numpy as jnp
from jax import lax
from jax.experimental import pallas as pl
from jax.experimental.pallas import tpu as pltpu


def _round_up(x, m):
    return (x + m - 1) // m * m


def eac_flash_kernel(xq_ref, xkv_ref, wq_ref, bq_ref, wkv_ref, bkv_ref,
                     gamma_ref, o_ref, q_sc, kv_sc, acc_sc, m_sc,
                     *, d_out, dk_pad, compute_dtype, exp_dtype):
    """One (batch, q-tile, kv-tile) grid step of EAC position attention.

    Block layouts (N = H*W on the lane axis):
      xq_ref  : (1, C, TQ)   query-side activation tile (also the residual)
      xkv_ref : (1, C, TK)   key/value-side activation tile (read at qi==0 only)
      wq_ref  : (DK, C)  compute_dtype,  bq_ref : (DK, 1)  f32
      wkv_ref : (DK+DV, C) compute_dtype, bkv_ref: (DK+DV, 1) f32
                (rows [0:D]  = K weights, rows [DK:DK+D] = V weights,
                 row DK+D has zero weights and bias 1.0 -> the "ones row")
      gamma   : (1,) scalar in SMEM
      o_ref   : (1, D, TQ)
      scratch : q_sc (DK, TQ) compute_dtype        -- Q tile, reused across kv
                kv_sc (DK+DV, N) compute_dtype     -- per-batch K/V cache
                acc_sc (DV, TQ) f32                -- AV accumulator; row d_out = l
                m_sc (1, TQ) f32                   -- running max
    """
    qi = pl.program_id(1)
    ki = pl.program_id(2)
    tk = xkv_ref.shape[2]

    # ---- K/V projection: once per (batch, kv-tile), cached in VMEM ----------
    @pl.when(qi == 0)
    def _fill_kv_cache():
        xkv = xkv_ref[0].astype(compute_dtype)                        # (C, TK)
        kv = lax.dot_general(
            wkv_ref[...], xkv,
            dimension_numbers=(((1,), (0,)), ((), ())),
            preferred_element_type=jnp.float32) + bkv_ref[...]        # (DK+DV, TK) f32
        off = pl.multiple_of(ki * tk, tk)
        kv_sc[:, pl.ds(off, tk)] = kv.astype(compute_dtype)

    # ---- Q projection + online-softmax state init: once per q-tile ----------
    @pl.when(ki == 0)
    def _init():
        xq = xq_ref[0].astype(compute_dtype)                          # (C, TQ)
        q = lax.dot_general(
            wq_ref[...], xq,
            dimension_numbers=(((1,), (0,)), ((), ())),
            preferred_element_type=jnp.float32) + bq_ref[...]         # (DK, TQ)
        q_sc[...] = q.astype(compute_dtype)
        m_sc[...] = jnp.full_like(m_sc, -jnp.inf)
        acc_sc[...] = jnp.zeros_like(acc_sc)

    off = pl.multiple_of(ki * tk, tk)
    k = kv_sc[:dk_pad, pl.ds(off, tk)]                                # (DK, TK)
    v = kv_sc[dk_pad:, pl.ds(off, tk)]                                # (DV, TK); row d_out == 1

    # energy in (TK, TQ) orientation so the query axis stays on lanes:
    #   e[j, i] = sum_d K[d, j] * Q[d, i]   (K padding rows are zero)
    e = lax.dot_general(k, q_sc[...],
                        dimension_numbers=(((0,), (0,)), ((), ())),
                        preferred_element_type=jnp.float32)           # (TK, TQ)

    # Online softmax over the kv (sublane) axis.
    m_prev = m_sc[...]
    m_new = jnp.maximum(m_prev, jnp.max(e, axis=0, keepdims=True))    # (1, TQ)
    alpha = jnp.exp(m_prev - m_new)                                   # (1, TQ) f32
    p = jnp.exp((e - m_new).astype(exp_dtype)).astype(compute_dtype)  # (TK, TQ)
    # Ones-row of V makes row d_out of the accumulator carry the softmax
    # denominator l -> no separate TKxTQ cross-sublane sum per step.
    acc_sc[...] = alpha * acc_sc[...] + lax.dot_general(
        v, p, dimension_numbers=(((1,), (0,)), ((), ())),
        preferred_element_type=jnp.float32)                           # (DV, TQ)
    m_sc[...] = m_new

    @pl.when(ki == pl.num_programs(2) - 1)
    def _finalize():
        l = acc_sc[d_out:d_out + 1, :]                                # (1, TQ)
        inv_l = pl.reciprocal(l, approx=True)                         # EUP slot
        out = acc_sc[:d_out, :] * inv_l                               # (D, TQ)
        gamma = gamma_ref[0]                                          # SMEM scalar
        residual = xq_ref[0].astype(jnp.float32)                      # (C, TQ) f32
        o_ref[0] = (gamma * out + residual).astype(o_ref.dtype)


def eac_module_forward(x_nchw, wq, bq, wk, bk, wv, bv, gamma, *,
                       tile_q=256, tile_k=256,
                       compute_dtype=jnp.float32,
                       exp_dtype=None):
    """EAC_Module forward.

    x_nchw: (B, C, H, W).  wq/wk/wv: (D, C) conv1x1 weights (out, in).
    bq/bk/bv: (D, 1).  gamma: (1,).
    compute_dtype: dtype fed to the MXU.  bfloat16 roughly doubles matmul rate
      and halves matmul-input/cache VMEM on every generation (v5e included);
      float32 for strict accuracy.  Accumulation, softmax statistics and the
      residual are always f32.
    exp_dtype: dtype for the exp of the scores.  bfloat16 doubles EUP exp
      throughput on v6e/v7x; keep float32 (default) on v5e.
    tile_q/tile_k: 256 fills the 256-wide MXU on v6e/v7x; 128 is enough on
      v5e's 128-wide MXU.  Sweep per shape; for small D the kernel is
      EUP/VPU-bound, not MXU-bound, and tile size mainly amortizes per-step
      grid overhead.
    """
    B, C, H, W = x_nchw.shape
    N = H * W
    D = wq.shape[0]
    assert D == C, "EAC_Module requires out_dim == in_dim for the residual/view."
    if exp_dtype is None:
        exp_dtype = jnp.float32

    # NCHW -> (B, C, N): a pure reshape (no transpose, no extra HBM traffic).
    x_bcn = x_nchw.reshape(B, C, N)

    tq = tile_q if N % tile_q == 0 else N
    tk = tile_k if N % tile_k == 0 else N
    # (8,128) layout rule: lane dim of every block must be a multiple of 128
    # or equal the full array extent.
    assert tq == N or tq % 128 == 0
    assert tk == N or tk % 128 == 0

    # Pad the projection dims to sublane multiples so the fused K/V split is
    # layout-aligned, and give the V block one extra "ones row" (zero weight,
    # bias 1.0) that turns the AV matmul into a fused AV + l reduction.
    dk_pad = _round_up(D, 8)           # K rows (also Q rows)
    dv_pad = _round_up(D + 1, 8)       # V rows + ones row
    dkv = dk_pad + dv_pad

    f32 = jnp.float32
    # Pre-cast weights to compute_dtype in the wrapper (no in-kernel casts).
    wq_pad = (jnp.zeros((dk_pad, C), f32).at[:D].set(wq.astype(f32))
              .astype(compute_dtype))
    bq_pad = jnp.zeros((dk_pad, 1), f32).at[:D].set(bq.astype(f32))
    w_kv = (jnp.zeros((dkv, C), f32)
            .at[:D].set(wk.astype(f32))
            .at[dk_pad:dk_pad + D].set(wv.astype(f32))
            .astype(compute_dtype))
    b_kv = (jnp.zeros((dkv, 1), f32)
            .at[:D].set(bk.astype(f32))
            .at[dk_pad:dk_pad + D].set(bv.astype(f32))
            .at[dk_pad + D].set(1.0))                 # the ones-row bias

    grid = (B, N // tq, N // tk)
    n_q = N // tq

    itemsize = jnp.dtype(x_nchw.dtype).itemsize
    w_itemsize = jnp.dtype(compute_dtype).itemsize
    cost = pl.CostEstimate(
        flops=int(B * (2 * C * (dk_pad + dkv) * N
                       + 2 * (dk_pad + dv_pad) * N * N)),
        transcendentals=int(B * N * N),
        bytes_accessed=int(
            B * C * N * itemsize                              # xq reads
            + B * C * N * itemsize                            # xkv reads (qi==0 sweep)
            + B * max(n_q - 1, 0) * C * tk * itemsize         # xkv refetch per q-tile switch
            + B * C * N * itemsize                            # output write
            + (wq_pad.size + w_kv.size) * w_itemsize
            + (bq_pad.size + b_kv.size) * 4),
    )

    kernel = functools.partial(
        eac_flash_kernel, d_out=D, dk_pad=dk_pad,
        compute_dtype=compute_dtype, exp_dtype=exp_dtype)

    out_bcn = pl.pallas_call(
        kernel,
        out_shape=jax.ShapeDtypeStruct((B, C, N), x_nchw.dtype),
        grid_spec=pltpu.PrefetchScalarGridSpec(
            num_scalar_prefetch=0,
            grid=grid,
            in_specs=[
                # x (q side / residual): changes only with (b, qi).
                pl.BlockSpec((1, C, tq), lambda b, qi, ki: (b, 0, qi)),
                # x (kv side): real tile only during the qi==0 cache-fill sweep;
                # afterwards collapse to a fixed block so no HBM re-fetch occurs.
                pl.BlockSpec((1, C, tk),
                             lambda b, qi, ki: (b, 0, jnp.where(qi == 0, ki, 0))),
                pl.BlockSpec((dk_pad, C), lambda b, qi, ki: (0, 0)),   # wq (pre-cast)
                pl.BlockSpec((dk_pad, 1), lambda b, qi, ki: (0, 0)),   # bq (f32)
                pl.BlockSpec((dkv, C), lambda b, qi, ki: (0, 0)),      # w_kv fused (pre-cast)
                pl.BlockSpec((dkv, 1), lambda b, qi, ki: (0, 0)),      # b_kv fused (f32)
                pl.BlockSpec(memory_space=pltpu.MemorySpace.SMEM),     # gamma scalar
            ],
            out_specs=pl.BlockSpec((1, D, tq), lambda b, qi, ki: (b, 0, qi)),
            scratch_shapes=[
                pltpu.VMEM((dk_pad, tq), compute_dtype),   # Q tile (reused across kv)
                pltpu.VMEM((dkv, N), compute_dtype),       # per-batch K/V cache
                pltpu.VMEM((dv_pad, tq), jnp.float32),     # AV accumulator (+ l row)
                pltpu.VMEM((1, tq), jnp.float32),          # running max m
            ],
        ),
        compiler_params=pltpu.CompilerParams(
            # qi must be "arbitrary": the K/V cache is filled at qi==0 and
            # reused by later q-tiles, so the qi axis cannot be megacore-split.
            dimension_semantics=("parallel", "arbitrary", "arbitrary"),
            vmem_limit_bytes=48 * 1024 * 1024,   # headroom even on v7x (64 MiB VMEM)
        ),
        cost_estimate=cost,
    )(x_bcn, x_bcn, wq_pad, bq_pad, w_kv, b_kv, gamma)

    return out_bcn.reshape(B, C, H, W)


def reference_forward(x_nchw, wq, bq, wk, bk, wv, bv, gamma):
    """Plain-JAX reference mirroring the PyTorch forward."""
    B, C, H, W = x_nchw.shape
    N = H * W
    xf = x_nchw.reshape(B, C, N).astype(jnp.float32)
    q = jnp.einsum("dc,bcn->bdn", wq, xf) + bq[None]          # (B, D, N)
    k = jnp.einsum("dc,bcn->bdn", wk, xf) + bk[None]
    v = jnp.einsum("dc,bcn->bdn", wv, xf) + bv[None]
    energy = jnp.einsum("bdn,bdm->bnm", q, k)                 # (B, Nq, Nk)
    att = jax.nn.softmax(energy, axis=-1)
    out = jnp.einsum("bdm,bnm->bdn", v, att)                  # V @ att^T
    out = gamma[0] * out + xf
    return out.reshape(B, C, H, W).astype(x_nchw.dtype)


if __name__ == "__main__":
    key = jax.random.PRNGKey(0)
    k_x, k_wq, k_bq, k_wk, k_bk, k_wv, k_bv = jax.random.split(key, 7)

    # Small shapes consistent with the module: in_dim == out_dim == 4, N = 256.
    B, C, H, W = 2, 4, 16, 16
    D = C

    x = jax.random.normal(k_x, (B, C, H, W), dtype=jnp.float32)

    # Conv1x1 weights stored as (C_out, C_in), biases as (C_out, 1).
    wq = jax.random.normal(k_wq, (D, C), dtype=jnp.float32) * 0.1
    bq = jax.random.normal(k_bq, (D, 1), dtype=jnp.float32) * 0.1
    wk = jax.random.normal(k_wk, (D, C), dtype=jnp.float32) * 0.1
    bk = jax.random.normal(k_bk, (D, 1), dtype=jnp.float32) * 0.1
    wv = jax.random.normal(k_wv, (D, C), dtype=jnp.float32) * 0.1
    bv = jax.random.normal(k_bv, (D, 1), dtype=jnp.float32) * 0.1
    # PyTorch inits gamma to 0 (output would equal x); use 0.5 so the attention
    # path is actually exercised.  Set to 0.0 to match nn.Parameter(torch.zeros(1)).
    gamma = jnp.full((1,), 0.5, dtype=jnp.float32)

    ref = reference_forward(x, wq, bq, wk, bk, wv, bv, gamma)

    # f32-on-MXU path with 128-wide tiles: exercises the multi-(q,kv)-tile
    # grid, the qi==0 K/V cache fill + reuse, and multi-step online softmax.
    out_f32 = eac_module_forward(x, wq, bq, wk, bk, wv, bv, gamma,
                                 tile_q=128, tile_k=128,
                                 compute_dtype=jnp.float32)
    out_f32 = jax.block_until_ready(out_f32)
    assert out_f32.shape == (B, C, H, W)
    assert jnp.allclose(out_f32, ref, atol=3e-3, rtol=3e-3), "f32 mismatch vs ref"

    # bf16-on-MXU path with default 256-wide tiles (v6e/v7x MXU width) and
    # bf16 exp (v6e/v7x EUP); accumulation / stats / residual stay f32.
    out_bf16 = eac_module_forward(x, wq, bq, wk, bk, wv, bv, gamma,
                                  compute_dtype=jnp.bfloat16,
                                  exp_dtype=jnp.bfloat16)
    out_bf16 = jax.block_until_ready(out_bf16)
    assert jnp.allclose(out_bf16, ref, atol=5e-2, rtol=5e-2), "bf16 mismatch vs ref"

    print("KERNEL_OK")
</pallas_src>

<mosaic_0001>
module attributes {stable_mosaic.version = 11 : i64} {
  func.func @eac_flash_kernel(%arg0: i32, %arg1: i32, %arg2: i32, %arg3: memref<1x4x128xf32, #tpu.memory_space<vmem>>, %arg4: memref<1x4x128xf32, #tpu.memory_space<vmem>>, %arg5: memref<8x4xf32, #tpu.memory_space<vmem>>, %arg6: memref<8x1xf32, #tpu.memory_space<vmem>>, %arg7: memref<16x4xf32, #tpu.memory_space<vmem>>, %arg8: memref<16x1xf32, #tpu.memory_space<vmem>>, %arg9: memref<1xf32, #tpu.memory_space<smem>>, %arg10: memref<1x4x128xf32, #tpu.memory_space<vmem>>, %arg11: memref<8x128xf32, #tpu.memory_space<vmem>>, %arg12: memref<16x256xf32, #tpu.memory_space<vmem>>, %arg13: memref<8x128xf32, #tpu.memory_space<vmem>>, %arg14: memref<1x128xf32, #tpu.memory_space<vmem>>) attributes {dimension_semantics = [#tpu.dimension_semantics<parallel>, #tpu.dimension_semantics<arbitrary>, #tpu.dimension_semantics<arbitrary>], iteration_bounds = array<i64: 2, 2, 2>, scalar_prefetch = 0 : i64, scratch_operands = 4 : i64, tpu.core_type = #tpu.core_type<tc>, window_params = [{transform_indices = @transform_0, window_bounds = array<i64: 1, 4, 128>}, {transform_indices = @transform_1, window_bounds = array<i64: 1, 4, 128>}, {pipeline_mode = #tpu.pipeline_mode<synchronous>, transform_indices = @transform_2, window_bounds = array<i64: 8, 4>}, {pipeline_mode = #tpu.pipeline_mode<synchronous>, transform_indices = @transform_3, window_bounds = array<i64: 8, 1>}, {pipeline_mode = #tpu.pipeline_mode<synchronous>, transform_indices = @transform_4, window_bounds = array<i64: 16, 4>}, {pipeline_mode = #tpu.pipeline_mode<synchronous>, transform_indices = @transform_5, window_bounds = array<i64: 16, 1>}, {transform_indices = @transform_6, window_bounds = array<i64: 1>}, {transform_indices = @transform_7, window_bounds = array<i64: 1, 4, 128>}]} {
    %c0_i32 = arith.constant 0 : i32
    %0 = arith.cmpi eq, %arg1, %c0_i32 : i32
    %1 = arith.extui %0 : i1 to i32
    %c0_i32_0 = arith.constant 0 : i32
    %2 = arith.cmpi ne, %1, %c0_i32_0 : i32
    scf.if %2 {
      %c0_16 = arith.constant 0 : index
      %c0_17 = arith.constant 0 : index
      %c0_18 = arith.constant 0 : index
      %33 = vector.load %arg4[%c0_16, %c0_17, %c0_18] : memref<1x4x128xf32, #tpu.memory_space<vmem>>, vector<1x4x128xf32>
      %34 = vector.shape_cast %33 : vector<1x4x128xf32> to vector<4x128xf32>
      %c0_19 = arith.constant 0 : index
      %c0_20 = arith.constant 0 : index
      %35 = vector.load %arg7[%c0_19, %c0_20] : memref<16x4xf32, #tpu.memory_space<vmem>>, vector<16x4xf32>
      %cst_21 = arith.constant dense<0.000000e+00> : vector<16x128xf32>
      %36 = tpu.matmul %35, %34, %cst_21 {dimension_numbers = #tpu.dot_dimension_numbers<[1], [0], [0], [1], [0, 0, 1, 1], [], []>} : vector<16x4xf32>, vector<4x128xf32>, vector<16x128xf32> -> vector<16x128xf32>
      %c0_22 = arith.constant 0 : index
      %c0_23 = arith.constant 0 : index
      %37 = vector.load %arg8[%c0_22, %c0_23] : memref<16x1xf32, #tpu.memory_space<vmem>>, vector<16x1xf32>
      %38 = vector.broadcast %37 : vector<16x1xf32> to vector<16x128xf32>
      %39 = arith.addf %36, %38 : vector<16x128xf32>
      %c128_i32_24 = arith.constant 128 : i32
      %40 = arith.muli %arg2, %c128_i32_24 : i32
      %41 = tpu.assume_multiple %40, 128 : i32
      %c0_25 = arith.constant 0 : index
      %42 = arith.index_cast %41 : i32 to index
      %43 = vector.load %arg12[%c0_25, %42] : memref<16x256xf32, #tpu.memory_space<vmem>>, vector<16x128xf32>
      tpu.vector_store %arg12[%c0_25, %42], %39 {strides = array<i32>} : memref<16x256xf32, #tpu.memory_space<vmem>>, vector<16x128xf32>,
    } else {
    }
    %c0_i32_1 = arith.constant 0 : i32
    %3 = arith.cmpi eq, %arg2, %c0_i32_1 : i32
    %4 = arith.extui %3 : i1 to i32
    %c0_i32_2 = arith.constant 0 : i32
    %5 = arith.cmpi ne, %4, %c0_i32_2 : i32
    scf.if %5 {
      %c0_16 = arith.constant 0 : index
      %c0_17 = arith.constant 0 : index
      %c0_18 = arith.constant 0 : index
      %33 = vector.load %arg3[%c0_16, %c0_17, %c0_18] : memref<1x4x128xf32, #tpu.memory_space<vmem>>, vector<1x4x128xf32>
      %34 = vector.shape_cast %33 : vector<1x4x128xf32> to vector<4x128xf32>
      %c0_19 = arith.constant 0 : index
      %c0_20 = arith.constant 0 : index
      %35 = vector.load %arg5[%c0_19, %c0_20] : memref<8x4xf32, #tpu.memory_space<vmem>>, vector<8x4xf32>
      %cst_21 = arith.constant dense<0.000000e+00> : vector<8x128xf32>
      %36 = tpu.matmul %35, %34, %cst_21 {dimension_numbers = #tpu.dot_dimension_numbers<[1], [0], [0], [1], [0, 0, 1, 1], [], []>} : vector<8x4xf32>, vector<4x128xf32>, vector<8x128xf32> -> vector<8x128xf32>
      %c0_22 = arith.constant 0 : index
      %c0_23 = arith.constant 0 : index
      %37 = vector.load %arg6[%c0_22, %c0_23] : memref<8x1xf32, #tpu.memory_space<vmem>>, vector<8x1xf32>
      %38 = vector.broadcast %37 : vector<8x1xf32> to vector<8x128xf32>
      %39 = arith.addf %36, %38 : vector<8x128xf32>
      %c0_24 = arith.constant 0 : index
      %c0_25 = arith.constant 0 : index
      %40 = vector.load %arg11[%c0_24, %c0_25] : memref<8x128xf32, #tpu.memory_space<vmem>>, vector<8x128xf32>
      tpu.vector_store %arg11[%c0_24, %c0_25], %39 {strides = array<i32>} : memref<8x128xf32, #tpu.memory_space<vmem>>, vector<8x128xf32>,
      %cst_26 = arith.constant 0xFF800000 : f32
      %41 = vector.broadcast %cst_26 : f32 to vector<1x128xf32>
      %c0_27 = arith.constant 0 : index
      %c0_28 = arith.constant 0 : index
      %42 = vector.load %arg14[%c0_27, %c0_28] : memref<1x128xf32, #tpu.memory_space<vmem>>, vector<1x128xf32>
      tpu.vector_store %arg14[%c0_27, %c0_28], %41 {strides = array<i32>} : memref<1x128xf32, #tpu.memory_space<vmem>>, vector<1x128xf32>,
      %cst_29 = arith.constant 0.000000e+00 : f32
      %43 = vector.broadcast %cst_29 : f32 to vector<8x128xf32>
      %c0_30 = arith.constant 0 : index
      %c0_31 = arith.constant 0 : index
      %44 = vector.load %arg13[%c0_30, %c0_31] : memref<8x128xf32, #tpu.memory_space<vmem>>, vector<8x128xf32>
      tpu.vector_store %arg13[%c0_30, %c0_31], %43 {strides = array<i32>} : memref<8x128xf32, #tpu.memory_space<vmem>>, vector<8x128xf32>,
    } else {
    }
    %c128_i32 = arith.constant 128 : i32
    %6 = arith.muli %arg2, %c128_i32 : i32
    %7 = tpu.assume_multiple %6, 128 : i32
    %c0 = arith.constant 0 : index
    %8 = arith.index_cast %7 : i32 to index
    %9 = vector.load %arg12[%c0, %8] : memref<16x256xf32, #tpu.memory_space<vmem>>, vector<8x128xf32>
    %c8 = arith.constant 8 : index
    %10 = arith.index_cast %7 : i32 to index
    %11 = vector.load %arg12[%c8, %10] : memref<16x256xf32, #tpu.memory_space<vmem>>, vector<8x128xf32>
    %c0_3 = arith.constant 0 : index
    %c0_4 = arith.constant 0 : index
    %12 = vector.load %arg11[%c0_3, %c0_4] : memref<8x128xf32, #tpu.memory_space<vmem>>, vector<8x128xf32>
    %cst = arith.constant dense<0.000000e+00> : vector<128x128xf32>
    %13 = tpu.matmul %9, %12, %cst {dimension_numbers = #tpu.dot_dimension_numbers<[0], [0], [1], [1], [0, 1, 1, 1], [], []>} : vector<8x128xf32>, vector<8x128xf32>, vector<128x128xf32> -> vector<128x128xf32>
    %c0_5 = arith.constant 0 : index
    %c0_6 = arith.constant 0 : index
    %14 = vector.load %arg14[%c0_5, %c0_6] : memref<1x128xf32, #tpu.memory_space<vmem>>, vector<1x128xf32>
    %cst_7 = arith.constant dense<0xFF800000> : vector<128xf32>
    %15 = vector.multi_reduction <maximumf>, %13, %cst_7 [0] : vector<128x128xf32> to vector<128xf32>
    %16 = vector.shape_cast %15 : vector<128xf32> to vector<1x128xf32>
    %17 = arith.maximumf %14, %16 : vector<1x128xf32>
    %18 = arith.subf %14, %17 : vector<1x128xf32>
    %19 = math.exp %18 : vector<1x128xf32>
    %20 = vector.broadcast %17 : vector<1x128xf32> to vector<128x128xf32>
    %21 = arith.subf %13, %20 : vector<128x128xf32>
    %22 = math.exp %21 : vector<128x128xf32>
    %c0_8 = arith.constant 0 : index
    %c0_9 = arith.constant 0 : index
    %23 = vector.load %arg13[%c0_8, %c0_9] : memref<8x128xf32, #tpu.memory_space<vmem>>, vector<8x128xf32>
    %24 = vector.broadcast %19 : vector<1x128xf32> to vector<8x128xf32>
    %25 = arith.mulf %24, %23 : vector<8x128xf32>
    %cst_10 = arith.constant dense<0.000000e+00> : vector<8x128xf32>
    %26 = tpu.matmul %11, %22, %cst_10 {dimension_numbers = #tpu.dot_dimension_numbers<[1], [0], [0], [1], [0, 0, 1, 1], [], []>} : vector<8x128xf32>, vector<128x128xf32>, vector<8x128xf32> -> vector<8x128xf32>
    %27 = arith.addf %25, %26 : vector<8x128xf32>
    %c0_11 = arith.constant 0 : index
    %c0_12 = arith.constant 0 : index
    %28 = vector.load %arg13[%c0_11, %c0_12] : memref<8x128xf32, #tpu.memory_space<vmem>>, vector<8x128xf32>
    tpu.vector_store %arg13[%c0_11, %c0_12], %27 {strides = array<i32>} : memref<8x128xf32, #tpu.memory_space<vmem>>, vector<8x128xf32>,
    %c0_13 = arith.constant 0 : index
    %c0_14 = arith.constant 0 : index
    %29 = vector.load %arg14[%c0_13, %c0_14] : memref<1x128xf32, #tpu.memory_space<vmem>>, vector<1x128xf32>
    tpu.vector_store %arg14[%c0_13, %c0_14], %17 {strides = array<i32>} : memref<1x128xf32, #tpu.memory_space<vmem>>, vector<1x128xf32>,
    %c1_i32 = arith.constant 1 : i32
    %30 = arith.cmpi eq, %arg2, %c1_i32 : i32
    %31 = arith.extui %30 : i1 to i32
    %c0_i32_15 = arith.constant 0 : i32
    %32 = arith.cmpi ne, %31, %c0_i32_15 : i32
    scf.if %32 {
      %c4 = arith.constant 4 : index
      %c0_16 = arith.constant 0 : index
      %33 = vector.load %arg13[%c4, %c0_16] : memref<8x128xf32, #tpu.memory_space<vmem>>, vector<1x128xf32>
      %34 = tpu.reciprocal %33 {approx = true} : vector<1x128xf32> -> vector<1x128xf32>
      %c0_17 = arith.constant 0 : index
      %c0_18 = arith.constant 0 : index
      %35 = vector.load %arg13[%c0_17, %c0_18] : memref<8x128xf32, #tpu.memory_space<vmem>>, vector<4x128xf32>
      %36 = vector.broadcast %34 : vector<1x128xf32> to vector<4x128xf32>
      %37 = arith.mulf %35, %36 : vector<4x128xf32>
      %c0_19 = arith.constant 0 : index
      %38 = memref.load %arg9[%c0_19] : memref<1xf32, #tpu.memory_space<smem>>
      %c0_20 = arith.constant 0 : index
      %c0_21 = arith.constant 0 : index
      %c0_22 = arith.constant 0 : index
      %39 = vector.load %arg3[%c0_20, %c0_21, %c0_22] : memref<1x4x128xf32, #tpu.memory_space<vmem>>, vector<1x4x128xf32>
      %40 = vector.shape_cast %39 : vector<1x4x128xf32> to vector<4x128xf32>
      %41 = vector.broadcast %38 : f32 to vector<4x128xf32>
      %42 = arith.mulf %41, %37 : vector<4x128xf32>
      %43 = arith.addf %42, %40 : vector<4x128xf32>
      %c0_23 = arith.constant 0 : index
      %c0_24 = arith.constant 0 : index
      %c0_25 = arith.constant 0 : index
      %44 = vector.load %arg10[%c0_23, %c0_24, %c0_25] : memref<1x4x128xf32, #tpu.memory_space<vmem>>, vector<1x4x128xf32>
      %45 = vector.shape_cast %44 : vector<1x4x128xf32> to vector<4x128xf32>
      %46 = vector.shape_cast %43 : vector<4x128xf32> to vector<1x4x128xf32>
      tpu.vector_store %arg10[%c0_23, %c0_24, %c0_25], %46 {strides = array<i32>} : memref<1x4x128xf32, #tpu.memory_space<vmem>>, vector<1x4x128xf32>,
    } else {
    }
    return
  }
  func.func @transform_0(%arg0: i32, %arg1: i32, %arg2: i32) -> (i32, i32, i32) {
    %c0_i32 = arith.constant 0 : i32
    %c0_i32_0 = arith.constant 0 : i32
    return %arg0, %c0_i32, %arg1 : i32, i32, i32
  }
  func.func @transform_1(%arg0: i32, %arg1: i32, %arg2: i32) -> (i32, i32, i32) {
    %c0_i32 = arith.constant 0 : i32
    %0 = arith.cmpi eq, %arg1, %c0_i32 : i32
    %c0_i32_0 = arith.constant 0 : i32
    %1 = arith.select %0, %arg2, %c0_i32_0 : i32
    %c0_i32_1 = arith.constant 0 : i32
    %c0_i32_2 = arith.constant 0 : i32
    return %arg0, %c0_i32_1, %1 : i32, i32, i32
  }
  func.func @transform_2(%arg0: i32, %arg1: i32, %arg2: i32) -> (i32, i32) {
    %c0_i32 = arith.constant 0 : i32
    %c0_i32_0 = arith.constant 0 : i32
    %c0_i32_1 = arith.constant 0 : i32
    return %c0_i32, %c0_i32_0 : i32, i32
  }
  func.func @transform_3(%arg0: i32, %arg1: i32, %arg2: i32) -> (i32, i32) {
    %c0_i32 = arith.constant 0 : i32
    %c0_i32_0 = arith.constant 0 : i32
    %c0_i32_1 = arith.constant 0 : i32
    return %c0_i32, %c0_i32_0 : i32, i32
  }
  func.func @transform_4(%arg0: i32, %arg1: i32, %arg2: i32) -> (i32, i32) {
    %c0_i32 = arith.constant 0 : i32
    %c0_i32_0 = arith.constant 0 : i32
    %c0_i32_1 = arith.constant 0 : i32
    return %c0_i32, %c0_i32_0 : i32, i32
  }
  func.func @transform_5(%arg0: i32, %arg1: i32, %arg2: i32) -> (i32, i32) {
    %c0_i32 = arith.constant 0 : i32
    %c0_i32_0 = arith.constant 0 : i32
    %c0_i32_1 = arith.constant 0 : i32
    return %c0_i32, %c0_i32_0 : i32, i32
  }
  func.func @transform_6(%arg0: i32, %arg1: i32, %arg2: i32) -> i32 {
    %c0_i32 = arith.constant 0 : i32
    %c0_i32_0 = arith.constant 0 : i32
    return %c0_i32 : i32
  }
  func.func @transform_7(%arg0: i32, %arg1: i32, %arg2: i32) -> (i32, i32, i32) {
    %c0_i32 = arith.constant 0 : i32
    %c0_i32_0 = arith.constant 0 : i32
    return %arg0, %c0_i32, %arg1 : i32, i32, i32
  }
}

</mosaic_0001>

<bundles_post_ra>
// kernel: tpu_custom_call.1
= control target key start
LH: loop header
LB: loop body
LE: loop exit
PB: predicated region body
PF: predicated region fallthrough
CT: control target
= control target key end

     0   :  { %s1815_s0 = inlined_call_operand.vmem [shape: f32[2,4,256], index: 0, kind: input, shape index: {}]   ;;  %s1816_s1 = inlined_call_operand.vmem [shape: f32[2,4,256], index: 1, kind: input, shape index: {}]   ;;  %s1817_s2 = inlined_call_operand.vmem [shape: f32[8,4], index: 2, kind: input, shape index: {}]   ;;  %s1818_s3 = inlined_call_operand.vmem [shape: f32[8,1], index: 3, kind: input, shape index: {}]   ;;  %s1819_s4 = inlined_call_operand.vmem [shape: f32[16,4], index: 4, kind: input, shape index: {}]   ;;  %s1820_s5 = inlined_call_operand.vmem [shape: f32[16,1], index: 5, kind: input, shape index: {}]   ;;  %s1821_s6 = inlined_call_operand.<no memory space> [shape: f32[1], index: 6, kind: input, shape index: {}]   ;;  %s1822_s7 = inlined_call_operand.hbm [shape: f32[2,4,256], index: 7, kind: output, shape index: {}]  }
   0x1   :  { %12 = sst [smem:[#allocation6]] %s1821_s6 }
   0x2   :  { %13 = vsyncpa [#allocation8], 0 }
   0x3   :  { %15 = vsyncpa [#allocation8 + $0x1], 0  ;;  %s1569_s26 = smov 0   ;;  %s1571_s27 = smov 0  }
   0x4   :  { %s1573_s28 = smov 0   ;;  %s1575_s29 = smov 0  }
   0x5   :  { %s1577_s30 = smov 0   ;;  %s1579_s8 = smov 0  }
   0x6   :  { %s1581_s9 = smov 0   ;;  %s1583_s10 = smov 0  }
   0x7   :  { %s1585_s11 = smov 0   ;;  %s1587_s6 = smov 0  }
   0x8 LB: > { %1830 = sst [smem:[#allocation10_spill]] %s1487_s28  ;;  %s1095_s12 = sadd.s32 4294967295, %s1515_s6   ;;  %s1515_s6 = sphi %s1587_s6, %s21_s6   ;;  %s1511_s11 = sphi %s1585_s11, %s1848_s11   ;;  %s1507_s10 = sphi %s1583_s10, %s1847_s10   ;;  %s1503_s9 = sphi %s1581_s9, %s1846_s9   ;;  %s1499_s8 = sphi %s1579_s8, %s1845_s8   ;;  %s1495_s30 = sphi %s1577_s30, %s1844_s30   ;;  %s1491_s29 = sphi %s1575_s29, %s1843_s29   ;;  %s1487_s28 = sphi %s1573_s28, %s1842_s28   ;;  %s1483_s27 = sphi %s1571_s27, %s1850_s27   ;;  %s1479_s26 = sphi %s1569_s26, %s1849_s26  }
   0x9   : > { %1831 = sst [smem:[#allocation11_spill]] %s1503_s9  ;;  %s1096_s13 = sadd.s32 4294967294, %s1515_s6  }
   0xa   : > { %1832 = sst [smem:[#allocation12_spill]] %s1507_s10  ;;  %s33_s14 = sadd.s32 1, %s1503_s9 }
   0xb   : > { %1833 = sst [smem:[#allocation13_spill]] %s1511_s11  ;;  %p34_p0 = scmp.ge.s32.totalorder %s33_s14, 2 }
   0xc   : > { %s36_s15 = sadd.s32 1, %s1507_s10  ;;  %s40_s16 = sadd.s32 1, %s1511_s11 }
   0xd   : > { %p224_p1 = scmp.ne.s32.totalorder %s1487_s28, %s1483_s27  ;;  %s1852_s14 = smov (%p34_p0, %s33_s14), 0 }
   0xe   : > { %1834 = sst [smem:[#allocation14_spill]] %s1852_s14  ;;  %s1854_s15 = smov (!%p34_p0, %s36_s15), %s1507_s10 }
   0xf   : > { %p225_p2 = scmp.eq.s32.totalorder %s1095_s12, 7  ;;  %p230_p3 = scmp.ne.s32.totalorder %s1483_s27, %s1479_s26 }
  0x10   : > { %p38_p4 = scmp.ge.s32.totalorder %s1854_s15, 2  ;;  %p231_p5 = scmp.eq.s32.totalorder %s1096_s13, 7 }
  0x11   : > { %p1631_p6 = por %p225_p2, %p224_p1  ;;  %p1099_p8 = scmp.ge.s32.totalorder %s1515_s6, 1 }
  0x12   : > { %s1856_s15 = smov (%p38_p4, %s1854_s15), 0  ;;  %s1858_s16 = smov (!%p38_p4, %s40_s16), %s1511_s11 }
  0x13   : > { %1836 = sst [smem:[#allocation15_spill]] %s1856_s15  ;;  %p1638_p7 = por %p231_p5, %p230_p3 }
  0x14   : > { %p42_p9 = scmp.ge.s32.totalorder %s1858_s16, 2  ;;  %p290_p10 = scmp.lt.s32.totalorder %s1515_s6, 9 }
  0x15   : > { %s210_s19 = ssub.s32 %s1507_s10, %s1856_s15  ;;  %s214_s22 = sadd.s32 1, %s1487_s28 }
  0x16   : > { %s1860_s16 = smov (%p42_p9, %s1858_s16), 0  ;;  %p291_p11 = pnand %p1099_p8, %p290_p10 }
  0x17   : > { %1838 = sst [smem:[#allocation16_spill]] %s1860_s16  ;;  %s209_s20 = ssub.s32 %s1511_s11, %s1860_s16 }
  0x18   : > { %s211_s21 = sor.u32 %s210_s19, %s209_s20  ;;  %294 = sbr.rel (%p291_p11) target bundleno = 1230 (0x4ce), region = 48 }
  0x19   : > { %p212_p12 = scmp.eq.s32.totalorder %s211_s21, 0  ;;  %s1827_s24 = sand.u32 (!%p291_p11), 1, %s1483_s27  }
  0x1a   : > { %p335_p13 = scmp.lt.s32.totalorder (!%p291_p11), %s1499_s8, 1  ;;  %s1658_s25 = sshll.u32 (!%p291_p11), %s1827_s24, 2 }
  0x1b   : > { %s1652_s23 = scalar_select %p212_p12, %s1487_s28, %s214_s22  }
  0x1c   : > { %p337_p0 = scmp.lt.s32.totalorder (!%p291_p11), %s1495_s30, 1  ;;  %p343_p1 = scmp.eq.s32.totalorder (!%p291_p11), %s1495_s30, 0 }
  0x1d   : > { %1839 = sst [smem:[#allocation17_spill]] %s1652_s23  ;;  %s334_s28 = scalar_lea.vmem (!%p291_p11), [#allocation7], %s1658_s25 }
  0x1e   : > { %p1105_p3 = scmp.ne.s32.totalorder (!%p291_p11), %s1495_s30, 0 }
  0x1f   : > { %s336_s12 = scalar_select %p335_p13, %s1499_s8, 1 }
  0x20   : > { %s338_s13 = scalar_select %p337_p0, %s1495_s30, 1 }
  0x21   : > { %s1101_s19 = sshll.u32 %s336_s12, 1  ;;  %vm381_vm0 = vcmask (!%p1105_p3), 1043456   ;;  %v360_v1 = vld [vmem:[%s1819_s4] sm:$0xff] (!%p1105_p3)  ;;  %vm374_vm1 = vcmask (!%p1105_p3), 31744   ;;  %v361_v2 = vld [vmem:[%s1819_s4 + $0x8] sm:$0xff] (!%p1105_p3)  ;;  %v1517_v4 = vmov (!%p1105_p3), 0  }
  0x22   : > { %s340_s20 = sadd.s32 %s1101_s19, %s338_s13  ;;  %1179 = vmatprep.mubr.msk.f32.mxu0 (!%p1105_p3), %vm374_vm1, %v360_v1  ;;  %v362_v3 = vld [vmem:[%s1820_s5] sm:$0xff] (!%p1105_p3)  ;;  %1367 = vset.pattern.permute.xlu0 (!%p1105_p3), %v1517_v4  ;;  %v363_v5 = vld [vmem:[%s1820_s5 + $0x8] sm:$0xff] (!%p1105_p3) }
  0x23   : > { %s1102_s21 = sshll.u32 %s340_s20, 2  ;;  %366 = vperm.xlu0 (!%p1105_p3), %1367, %v362_v3  }
  0x24   : > { %s1667_s15 = scalar_lea.vmem %s1815_s0, %s1102_s21 }
  0x25   : > { %s344_s14 = scalar_select %p343_p1, %s1491_s29, 0 }
  0x26   : > { %358 = sbr.rel (%p1105_p3) target bundleno = 264 (0x108), region = 52 }
  0x27   : > { %p347_p2 = scmp.lt.s32.totalorder %s344_s14, 1  ;;  %371 = vperm.xlu0 (!%p1105_p3), %1367, %v363_v5  }
  0x29   : > { %s1862_s14 = smov (!%p347_p2, %s344_s14), 1 }
  0x2a   : > { %s350_s11 = sadd.s32 %s1101_s19, %s1862_s14 }
  0x2b   : > { %s1104_s10 = sshll.u32 %s350_s11, 2 }
  0x2c   : > { %s352_s23 = scalar_lea.vmem %s1816_s1, %s1104_s10 }
  0x2d   : > { %v359_v0 = vld [vmem:[%s352_s23] sm:$0xf]  ;;  %s1109_s23 = sshll.u32 %s1491_s29, 7 }
  0x2e   : > { %1177 = vmatprep.subr.msk.mxu0 %vm381_vm0, %v359_v0  ;;  %s461_s24 = sshra.s32 %s1109_s23, 7 }
  0x2f   : > { %1178 = vmatpush3.msk.msra.mxu0 %vm381_vm0, %v359_v0  ;;  %s1110_s19 = sshll.u32 %s461_s24, 3 }
  0x30   : > { %1180 = vmatmul.mubr.msk.f32.vlgmr.msra.gmra.mrb[0].mxu0 %vm374_vm1, %v361_v2  ;;  %s464_s21 = scalar_lea.vmem [#allocation3], %s1110_s19 }
  0xa2   : > { %v367_v6 = vpop.permute.xlu0 %366 }
  0xa6   : > { %v372_v7 = vpop.permute.xlu0 %371 }
 0x103   : > { %v1181_v8 = vpop.f32.mrb[0].mxu0 }
 0x104   : > { %v457_v9 = vadd.f32 %v1181_v8, %v372_v7  ;;  %v451_v10 = vpop.f32.mrb[1].mxu0 }
 0x105   : > { %v452_v11 = vadd.f32 %v451_v10, %v367_v6 }
 0x106   : > { %466 = vst [vmem:[%s464_s21 + $0x10] sm:$0xff] %v457_v9 }
 0x107   : > { %465 = vst [vmem:[%s464_s21] sm:$0xff] %v452_v11 }
 0x108 PF: > { %p1111_p4 = scmp.ne.s32.totalorder %s1491_s29, 0 }
 0x109   : > { %v471_v12 = vld [vmem:[%s1667_s15] sm:$0xf] (!%p1111_p4)  ;;  %vm483_vm2 = vcmask (!%p1111_p4), 1043456   ;;  %v1518_v14 = vmov (!%p1111_p4), 0.0   ;;  %vm1519_vm3 = vmmov (!%p1111_p4), 0   ;;  %vm479_vm4 = vcmask (!%p1111_p4), 31744  }
 0x10a   : > { %470 = sbr.rel (%p1111_p4) target bundleno = 483 (0x1e3), region = 56  ;;  %v472_v13 = vld [vmem:[%s1817_s2] sm:$0xff] (!%p1111_p4)  ;;  %1182 = vmatprep.subr.mxu0 (!%p1111_p4), %v1518_v14  ;;  %559 = vst [vmem:[#allocation4] sm:$0xff] (!%p1111_p4), %v1518_v14  ;;  %1184 = vmatprep.mubr.msk.f32.mxu0 (!%p1111_p4), %vm1519_vm3, %v1518_v14  ;;  %v1520_v16 = vmov (!%p1111_p4), 0   ;;  %v1521_v17 = vmov (!%p1111_p4), -inf  }
 0x10b   : > { %v473_v15 = vld [vmem:[%s1818_s3] sm:$0xff] (!%p1111_p4)  ;;  %1183 = vmatpush3.msk.msra.mxu0 (!%p1111_p4), %vm483_vm2, %v471_v12  ;;  %1368 = vset.pattern.permute.xlu0 (!%p1111_p4), %v1520_v16  ;;  %558 = vst [vmem:[#allocation5] sm:$0x1] (!%p1111_p4), %v1521_v17 }
 0x10c   : > { %1185 = vmatmul.mubr.msk.f32.vlgmr.msra.gmra.mrb[0].mxu0 (!%p1111_p4), %vm479_vm4, %v472_v13  ;;  %476 = vperm.xlu0 (!%p1111_p4), %1368, %v473_v15  }
 0x18b   : > { %v477_v18 = vpop.permute.xlu0 %476 }
 0x1df   : > { %v553_v19 = vpop.f32.mrb[0].mxu0 }
 0x1e0   : > { %v554_v20 = vadd.f32 %v553_v19, %v477_v18  ;;  %v1186_v21 = vpop.f32.mrb[1].mxu0 }
 0x1e2   : > { %557 = vst [vmem:[#allocation2] sm:$0xff] %v554_v20 }
 0x1e3 PF: > { %s1114_s20 = sshll.u32 %s1491_s29, 7  ;;  %vm600_vm5 = vcmask 64512   ;;  %v1522_v40 = vmov 0.0|0.0   ;;  %vm1523_vm6 = vmmov 0   ;;  %v1524_v42 = vmov 0.0   ;;  %p1132_p5 = scmp.ne.s32.totalorder %s1491_s29, 1 }
 0x1e4   : > { %s561_s9 = sshra.s32 %s1114_s20, 7  ;;  %1248 = vmatprep.subr.bf16.mxu1 %v1522_v40  ;;  %1245 = vmatprep.mubr.msk.f32.mxu1 %vm1523_vm6, %v1524_v42  ;;  %v821_v11 = vlaneseq  ;;  %v794_v16 = vld [vmem:[#allocation5] sm:$0x1]  ;;  %s967_s14 = sld [smem:[#allocation6]] (!%p1132_p5) }
 0x1e5   : > { %s1115_s10 = sshll.u32 %s561_s9, 3 }
 0x1e6   : > { %s1697_s11 = scalar_lea.vmem [#allocation3], %s1115_s10  ;;  %v822_v14 = vshrl.u32 %v821_v11, 7 }
 0x1e7   : > { %v565_v22 = vld [vmem:[%s1697_s11] sm:$0xff] }
 0x1e8   : > { %568 = vxpose.xlu0.b32.start.end [1/1] (short) %v565_v22, 128  ;;  %v1732_v18 = vsub.s32 0, %v822_v14 }
 0x1e9   : > { %v567_v23 = vld [vmem:[#allocation2] sm:$0xff] }
 0x1ea   : > { %1187 = vmatprep.subr.mxu0 %v567_v23 }
 0x1eb   : > { %1188 = vmatpush3.msra.mxu0 %v567_v23 }
 0x268   : > { %v584_v24 = vpop.trf.xlu0 }
 0x269   : > { %1189 = vmatprep.mubr.msk.f32.mxu0 %vm600_vm5, %v584_v24 }
 0x26c   : > { %v585_v25 = vpop.trf.xlu0 }
 0x26d   : > { %1190 = vmatmul.mubr.msk.f32.vlgmr.msra.gmra.mrb[0].mxu0 %vm600_vm5, %v585_v25 }
 0x270   : > { %v586_v26 = vpop.trf.xlu0 }
 0x271   : > { %1192 = vmatprep.mubr.msk.f32.mxu0 %vm600_vm5, %v586_v26 }
 0x274   : > { %v587_v27 = vpop.trf.xlu0 }
 0x275   : > { %1193 = vmatmul.mubr.msk.f32.gmra.mrb[2].mxu0 %vm600_vm5, %v587_v27 }
 0x278   : > { %v588_v28 = vpop.trf.xlu0 }
 0x279   : > { %1195 = vmatprep.mubr.msk.f32.mxu0 %vm600_vm5, %v588_v28 }
 0x27c   : > { %v589_v29 = vpop.trf.xlu0 }
 0x27d   : > { %1196 = vmatmul.mubr.msk.f32.gmra.mrb[4].mxu0 %vm600_vm5, %v589_v29 }
 0x280   : > { %v590_v30 = vpop.trf.xlu0 }
 0x281   : > { %1198 = vmatprep.mubr.msk.f32.mxu0 %vm600_vm5, %v590_v30 }
 0x284   : > { %v591_v31 = vpop.trf.xlu0 }
 0x285   : > { %1199 = vmatmul.mubr.msk.f32.gmra.mrb[6].mxu0 %vm600_vm5, %v591_v31 }
 0x288   : > { %v592_v32 = vpop.trf.xlu0 }
 0x289   : > { %1201 = vmatprep.mubr.msk.f32.mxu0 %vm600_vm5, %v592_v32 }
 0x28c   : > { %v593_v33 = vpop.trf.xlu0 }
 0x28d   : > { %1202 = vmatmul.mubr.msk.f32.gmra.mrb[8].mxu0 %vm600_vm5, %v593_v33 }
 0x290   : > { %v594_v34 = vpop.trf.xlu0 }
 0x291   : > { %1204 = vmatprep.mubr.msk.f32.mxu0 %vm600_vm5, %v594_v34 }
 0x294   : > { %v595_v35 = vpop.trf.xlu0 }
 0x295   : > { %1205 = vmatmul.mubr.msk.f32.gmra.mrb[10].mxu0 %vm600_vm5, %v595_v35 }
 0x298   : > { %v596_v36 = vpop.trf.xlu0 }
 0x299   : > { %1207 = vmatprep.mubr.msk.f32.mxu0 %vm600_vm5, %v596_v36 }
 0x29c   : > { %v597_v37 = vpop.trf.xlu0 }
 0x29d   : > { %1208 = vmatmul.mubr.msk.f32.gmra.mrb[12].mxu0 %vm600_vm5, %v597_v37 }
 0x2a0   : > { %v598_v38 = vpop.trf.xlu0 }
 0x2a1   : > { %1210 = vmatprep.mubr.msk.f32.mxu0 %vm600_vm5, %v598_v38 }
 0x2a4   : > { %v599_v39 = vpop.trf.xlu0 }
 0x2a5   : > { %1211 = vmatmul.mubr.msk.f32.gmra.mrb[14].mxu0 %vm600_vm5, %v599_v39 }
 0x340   : > { %v1191_v41 = vpop.f32.mrb[0].mxu0 }
 0x341   : > { %v715_v43 = vpop.f32.mrb[1].mxu0 }
 0x348   : > { %v1194_v44 = vpop.f32.mrb[2].mxu0 }
 0x349   : > { %v725_v45 = vpop.f32.mrb[3].mxu0 }
 0x350   : > { %v1197_v46 = vpop.f32.mrb[4].mxu0 }
 0x351   : > { %v796_v47 = vmax.f32 %v1191_v41, %v1197_v46  ;;  %v735_v48 = vpop.f32.mrb[5].mxu0 }
 0x352   : > { %v795_v49 = vmax.f32 %v715_v43, %v735_v48 }
 0x358   : > { %v1717_v50 = vpop.f32.mrb[6].mxu0 }
 0x359   : > { %v798_v51 = vmax.f32 %v1194_v44, %v1717_v50  ;;  %v745_v52 = vpop.f32.mrb[7].mxu0 }
 0x35a   : > { %v797_v53 = vmax.f32 %v725_v45, %v745_v52 }
 0x360   : > { %v1720_v54 = vpop.f32.mrb[8].mxu0 }
 0x361   : > { %v800_v55 = vmax.f32 %v796_v47, %v1720_v54  ;;  %v755_v56 = vpop.f32.mrb[9].mxu0 }
 0x362   : > { %v799_v57 = vmax.f32 %v795_v49, %v755_v56 }
 0x368   : > { %v1723_v58 = vpop.f32.mrb[10].mxu0 }
 0x369   : > { %v802_v59 = vmax.f32 %v798_v51, %v1723_v58  ;;  %v765_v60 = vpop.f32.mrb[11].mxu0 }
 0x36a   : > { %v801_v61 = vmax.f32 %v797_v53, %v765_v60 }
 0x370   : > { %v1726_v62 = vpop.f32.mrb[12].mxu0 }
 0x371   : > { %v804_v63 = vmax.f32 %v800_v55, %v1726_v62  ;;  %v775_v0 = vpop.f32.mrb[13].mxu0 }
 0x372   : > { %v803_v1 = vmax.f32 %v799_v57, %v775_v0 }
 0x374   : > { %v807_v2 = vmax.f32 %v803_v1, %v804_v63 }
 0x378   : > { %v1729_v3 = vpop.f32.mrb[14].mxu0 }
 0x379   : > { %v806_v4 = vmax.f32 %v802_v59, %v1729_v3  ;;  %v785_v5 = vpop.f32.mrb[15].mxu0 }
 0x37a   : > { %v805_v6 = vmax.f32 %v801_v61, %v785_v5 }
 0x37c   : > { %v808_v7 = vmax.f32 %v805_v6, %v806_v4 }
 0x37e   : > { %v809_v8 = vmax.f32 %v807_v2, %v808_v7 }
 0x380   : > { %v810_v9 = vrot.slane %v809_v8, 4 }
 0x382   : > { %v811_v10 = vmax.f32 %v809_v8, %v810_v9 }
 0x384   : > { %v812_v12 = vrot.slane %v811_v10, 2 }
 0x386   : > { %v813_v13 = vmax.f32 %v811_v10, %v812_v12 }
 0x388   : > { %v814_v15 = vrot.slane %v813_v13, 1 }
 0x38a   : > { %v815_v17 = vmax.f32 %v813_v13, %v814_v15 }
 0x38c   : > { %v816_v19 = vmax.f32 %v794_v16, %v815_v17 }
 0x38e   : > { %v824_v20 = vrot.slane %v816_v19, %v1732_v18  ;;  %954 = vst [vmem:[#allocation5] sm:$0x1] %v816_v19  ;;  %v817_v21 = vsub.f32 %v794_v16, %v816_v19  ;;  %v566_v19 = vld [vmem:[%s1697_s11 + $0x10] sm:$0xff] }
 0x390   : > { %v840_v22 = vsub.f32 %v785_v5, %v824_v20  ;;  %v826_v23 = vsub.f32 %v715_v43, %v824_v20  ;;  %v827_v24 = vsub.f32 %v1191_v41, %v824_v20  ;;  %v828_v25 = vsub.f32 %v725_v45, %v824_v20 }
 0x391   : > { %v829_v26 = vsub.f32 %v1194_v44, %v824_v20  ;;  %v830_v27 = vsub.f32 %v735_v48, %v824_v20  ;;  %v831_v28 = vsub.f32 %v1197_v46, %v824_v20  ;;  %v832_v29 = vsub.f32 %v745_v52, %v824_v20 }
 0x392   : > { %v870_v30 = vmul.f32 1.442695, %v840_v22  ;;  %v842_v31 = vmul.f32 1.442695, %v826_v23  ;;  %v844_v32 = vmul.f32 1.442695, %v827_v24  ;;  %v833_v33 = vsub.f32 %v1717_v50, %v824_v20 }
 0x393   : > { %v846_v34 = vmul.f32 1.442695, %v828_v25  ;;  %v834_v35 = vsub.f32 %v755_v56, %v824_v20  ;;  %v848_v36 = vmul.f32 1.442695, %v829_v26  ;;  %v850_v37 = vmul.f32 1.442695, %v830_v27 }
 0x394   : > { %1369 = vpow2.f32 %v870_v30  ;;  %v852_v38 = vmul.f32 1.442695, %v831_v28  ;;  %v835_v39 = vsub.f32 %v1720_v54, %v824_v20  ;;  %v836_v41 = vsub.f32 %v765_v60, %v824_v20  ;;  %v968_v30 = vld [vmem:[%s1667_s15] sm:$0xf] (!%p1132_p5) }
 0x395   : > { %1371 = vpow2.f32 %v842_v31  ;;  %v837_v42 = vsub.f32 %v1723_v58, %v824_v20  ;;  %v838_v43 = vsub.f32 %v775_v0, %v824_v20  ;;  %v839_v44 = vsub.f32 %v1726_v62, %v824_v20 }
 0x396   : > { %1373 = vpow2.f32 %v844_v32  ;;  %v854_v45 = vmul.f32 1.442695, %v832_v29  ;;  %v841_v46 = vsub.f32 %v1729_v3, %v824_v20  ;;  %v856_v47 = vmul.f32 1.442695, %v833_v33  ;;  %v874_v20 = vld [vmem:[#allocation4] sm:$0xff] }
 0x397   : > { %1375 = vpow2.f32 %v846_v34  ;;  %v858_v48 = vmul.f32 1.442695, %v834_v35  ;;  %v860_v49 = vmul.f32 1.442695, %v835_v39  ;;  %v862_v50 = vmul.f32 1.442695, %v836_v41 }
 0x398   : > { %1377 = vpow2.f32 %v848_v36  ;;  %v864_v51 = vmul.f32 1.442695, %v837_v42  ;;  %v866_v52 = vmul.f32 1.442695, %v838_v43  ;;  %v868_v54 = vmul.f32 1.442695, %v839_v44 }
 0x399   : > { %1379 = vpow2.f32 %v850_v37  ;;  %v872_v56 = vmul.f32 1.442695, %v841_v46  ;;  %v818_v58 = vmul.f32 1.442695, %v817_v21  ;;  %v969_v28 = vstv (!%p1132_p5), %s967_s14 }
 0x39a   : > { %1381 = vpow2.f32 %v852_v38 }
 0x39b   : > { %1383 = vpow2.f32 %v854_v45 }
 0x39c   : > { %1385 = vpow2.f32 %v856_v47 }
 0x39d   : > { %1387 = vpow2.f32 %v858_v48 }
 0x39e   : > { %v1370_v53 = vpop.eup %1369  ;;  %1389 = vpow2.f32 %v860_v49 }
 0x39f   : > { %v1372_v55 = vpop.eup %1371  ;;  %1391 = vpow2.f32 %v862_v50 }
 0x3a0   : > { %v1374_v57 = vpop.eup %1373  ;;  %1393 = vpow2.f32 %v864_v51 }
 0x3a1   : > { %v1376_v59 = vpop.eup %1375  ;;  %v1249_v60 = vpack.c.bf16 %v1374_v57, %v1372_v55  ;;  %1395 = vpow2.f32 %v866_v52 }
 0x3a2   : > { %v1378_v61 = vpop.eup %1377  ;;  %1397 = vpow2.f32 %v868_v54 }
 0x3a3   : > { %v1380_v62 = vpop.eup %1379  ;;  %1250 = vmatpush3.bf16.msra.mxu1 %v1249_v60  ;;  %v1252_v63 = vpack.c.bf16 %v1378_v61, %v1376_v59  ;;  %1399 = vpow2.f32 %v872_v56 }
 0x3a4   : > { %v1382_v0 = vpop.eup %1381  ;;  %1251 = vmatprep.subr.bf16.mxu1 %v1522_v40  ;;  %1401 = vpow2.f32 %v818_v58 }
 0x3a5   : > { %v1384_v1 = vpop.eup %1383  ;;  %v1255_v2 = vpack.c.bf16 %v1382_v0, %v1380_v62 }
 0x3a6   : > { %v1386_v3 = vpop.eup %1385 }
 0x3a7   : > { %v1388_v4 = vpop.eup %1387  ;;  %1253 = vmatpush3.bf16.msra.mxu1 %v1252_v63  ;;  %v1258_v5 = vpack.c.bf16 %v1386_v3, %v1384_v1 }
 0x3a8   : > { %v1390_v6 = vpop.eup %1389  ;;  %1254 = vmatprep.subr.bf16.mxu1 %v1522_v40 }
 0x3a9   : > { %v1392_v7 = vpop.eup %1391  ;;  %v1261_v8 = vpack.c.bf16 %v1390_v6, %v1388_v4 }
 0x3aa   : > { %v1394_v9 = vpop.eup %1393 }
 0x3ab   : > { %v1396_v10 = vpop.eup %1395  ;;  %1256 = vmatpush3.bf16.msra.mxu1 %v1255_v2  ;;  %v1264_v11 = vpack.c.bf16 %v1394_v9, %v1392_v7 }
 0x3ac   : > { %v1398_v12 = vpop.eup %1397  ;;  %1257 = vmatprep.subr.bf16.mxu1 %v1522_v40 }
 0x3ad   : > { %v1400_v13 = vpop.eup %1399  ;;  %v1267_v14 = vpack.c.bf16 %v1398_v12, %v1396_v10 }
 0x3ae   : > { %v1402_v15 = vpop.eup %1401  ;;  %v1270_v16 = vpack.c.bf16 %v1400_v13, %v1370_v53 }
 0x3af   : > { %1259 = vmatpush3.bf16.msra.mxu1 %v1258_v5  ;;  %v879_v17 = vrot.slane %v1402_v15, %v1732_v18 }
 0x3b0   : > { %1260 = vmatprep.subr.bf16.mxu1 %v1522_v40 }
 0x3b1   : > { %v881_v21 = vmul.f32 %v879_v17, %v874_v20 }
 0x3b3   : > { %1262 = vmatpush3.bf16.msra.mxu1 %v1261_v8 }
 0x3b4   : > { %1263 = vmatprep.subr.bf16.mxu1 %v1522_v40 }
 0x3b7   : > { %1265 = vmatpush3.bf16.msra.mxu1 %v1264_v11 }
 0x3b8   : > { %1266 = vmatprep.subr.bf16.mxu1 %v1522_v40 }
 0x3bb   : > { %1268 = vmatpush3.bf16.msra.mxu1 %v1267_v14 }
 0x3bc   : > { %1269 = vmatprep.subr.bf16.mxu1 %v1522_v40 }
 0x3bf   : > { %1271 = vmatpush3.bf16.msra.mxu1 %v1270_v16 }
 0x3c2   : > { %1246 = vmatmul.mubr.f32.vlgmr.msra.gmra.mrb[0].mxu1 %v566_v19 }
 0x492   : > { %958 = sbr.rel (%p1132_p5) target bundleno = 1204 (0x4b4), region = 60 }
 0x495   : > { %v948_v22 = vpop.f32.mrb[0].mxu1 }
 0x496   : > { %v952_v23 = vadd.f32 %v948_v22, %v881_v21  ;;  %v1247_v24 = vpop.f32.mrb[1].mxu1 }
 0x498   : > { %953 = vst [vmem:[#allocation4] sm:$0xff] %v952_v23 }
 0x49f   : > { %v959_v25 = vld [vmem:[#allocation4 + $0x4] sm:$0x1]  ;;  %v961_v27 = vld [vmem:[#allocation4] sm:$0xf] }
 0x4a0   : > { %1403 = vrcp.f32 %v959_v25 }
 0x4aa   : > { %v1404_v26 = vpop.eup %1403 }
 0x4ab   : > { %v965_v40 = vrot.slane %v1404_v26, %v1732_v18 }
 0x4ad   : > { %v966_v29 = vmul.f32 %v965_v40, %v961_v27 }
 0x4af   : > { %v970_v31 = vmul.f32 %v969_v28, %v966_v29 }
 0x4b1   : > { %v971_v32 = vadd.f32 %v970_v31, %v968_v30 }
 0x4b3   : > { %972 = vst [vmem:[%s334_s28] sm:$0xf] %v971_v32 }
 0x4b4 PF: > { %s1134_s29 = sshll.u32 %s1499_s8, 1  ;;  %s989_s24 = sshll.u32 %s334_s28, 4  ;;  %s1758_s24 = int_to_ptr.vmem [resolvable:$true] %s989_s24 }
 0x4b5   : > { %s985_s23 = sadd.s32 %s1495_s30, %s1134_s29  ;;  %s1840_s12 = sand.u32 1, %s1483_s27  }
 0x4b6   : > { %s1135_s19 = sshll.u32 %s985_s23, 6  ;;  %s974_s16 = scalar_lea.sflag [#allocation8], %s1840_s12 }
 0x4b7   : > { %s987_s15 = scalar_lea.hbm %s1822_s7, %s1135_s19  ;;  %s1405_s13 = scalar_lea.vmem %s1758_s24, 64 }
 0x4b8   : > { %p1406_p8 = scmp.ne.s32.totalorder %s1758_s24, %s1405_s13  ;;  %s1525_s30 = smov [#allocation7]  }
 0x4b9   : > { %s1409_s8 = sshll.u32 %s1525_s30, 4  ;;  %s1410_s8 = int_to_ptr.vmem [resolvable:$false] %s1409_s8 }
 0x4ba   : > { %p1407_p9 = pnand %p1406_p8, %p1631_p6  ;;  %s1411_s28 = scalar_lea.vmem %s1410_s8, 128 }
 0x4bb   : > { %p1412_p11 = scmp.lt.s32.totalorder %s1758_s24, %s1410_s8  ;;  %p1413_p12 = scmp.lt.s32.totalorder %s1411_s28, %s1405_s13 }
 0x4bc   : > { %p1408_p10 = pneg %p1407_p9 }
 0x4bd   : > { %p1414_p13 = por %p1413_p12, %p1412_p11 }
 0x4bf   : > { %p1415_p0 = pnand %p1414_p13, %p1408_p10 }
 0x4c1   : > { %1418 = shalt.err (!%p1415_p0)
}
 0x4c2   : > { %s1419_s25 = scalar_lea.hbm %s987_s15, 64  ;;  %s1423_s10 = scalar_lea.hbm %s1822_s7, 256 }
 0x4c3   : > { %p1420_p1 = scmp.ne.s32.totalorder %s987_s15, %s1419_s25  ;;  %p1424_p4 = scmp.lt.u32.totalorder %s987_s15, %s1822_s7 }
 0x4c4   : > { %p1425_p5 = scmp.lt.u32.totalorder %s1423_s10, %s1419_s25  ;;  %p1427_p9 = scmp.lt.u32.totalorder %s1419_s25, %s987_s15 }
 0x4c5   : > { %p1421_p2 = pnand %p1420_p1, %p1631_p6 }
 0x4c6   : > { %p1426_p8 = por %p1425_p5, %p1424_p4 }
 0x4c7   : > { %p1422_p3 = pneg %p1421_p2 }
 0x4c8   : > { %p1428_p11 = por %p1427_p9, %p1426_p8 }
 0x4ca   : > { %p1429_p10 = pnand %p1428_p11, %p1422_p3 }
 0x4cc   : > { %1432 = shalt.err (!%p1429_p10)
}
 0x4cd   : > { %1272 = dma.vmem_to_hbm [thread:$0]  (%p1631_p6), %s1758_s24, 64, %s987_s15, %s974_s16  }
 0x4ce PF: > { %p1278_p12 = scmp.ge.s32.totalorder %s1515_s6, 2  ;;  %s1001_s29 = sand.u32 1, %s1479_s26  }
 0x4cf   : > { %s1002_s23 = scalar_lea.sflag [#allocation8], %s1001_s29 }
 0x4d0   : > { %p1275_p13 = pnand %p1278_p12, %p1638_p7 }
 0x4d2   : > { %1474 = dma.done.wait (!%p1275_p13), %s1002_s23, 64  }
 0x4d3   : > { %1476 = vsyncadd (!%p1275_p13), %s1002_s23, 4294967232  ;;  %s21_s6 = sadd.s32 1, %s1515_s6   ;;  %s1841_s19 = sld [smem:[#allocation10_spill]] }
 0x4d4   : > { %p18_p0 = scmp.ge.s32.totalorder %s21_s6, 10   ;;  %s1842_s28 = sld [smem:[#allocation17_spill]] }
 0x4d5   : > { %s1843_s29 = sld [smem:[#allocation11_spill]]  ;;  %s1844_s30 = sld [smem:[#allocation12_spill]] }
 0x4d6   : > { %s1845_s8 = sld [smem:[#allocation13_spill]]  ;;  %s1846_s9 = sld [smem:[#allocation14_spill]] }
 0x4d7   : > { %s1847_s10 = sld [smem:[#allocation15_spill]]  ;;  %s1848_s11 = sld [smem:[#allocation16_spill]] }
 0x4d8   : > { %s1849_s26 = smov %s1483_s27  ;;  %20 = sbr.rel (!%p18_p0) target bundleno = 8 (0x8), region = 100 }
 0x4d9   : > { %s1850_s27 = smov %s1841_s19 }
 0x4df   :  { %1007 = vsyncpa [#allocation8], 1 }
 0x4e0   :  { %1009 = vsyncpa [#allocation8 + $0x1], 1 }

</bundles_post_ra>
